<compile_context>
chip_gen: v5e
topology: v5e:2x2
jax: 0.10.0
libtpu: 0.0.40
codegen_flags: <defaults>
</compile_context>

<pallas_src>
import jax
import jax.numpy as jnp
from jax.experimental import pallas as pl
from jax.experimental.pallas import tpu as pltpu

IN_FEATURES = 75
OUT_FEATURES = 1


def fc_kernel(x_ref, w_ref, b_ref, o_ref):
    # x_ref: (75, T) VMEM, w_ref: (1, 75) VMEM, b_ref: (1, 1) SMEM, o_ref: (1, T)
    acc = jnp.dot(w_ref[...], x_ref[...], preferred_element_type=jnp.float32)
    o_ref[...] = (acc + b_ref[0, 0]).astype(o_ref.dtype)


def _round_up(x, m):
    return ((x + m - 1) // m) * m


def fc_pallas_3d(x3d, w, b, *, tile):
    """x3d: (N, 75, HWp) f32 with HWp % tile == 0; w: (1, 75); b: (1, 1).

    Returns (N, 1, HWp) f32.
    """
    N, C, HWp = x3d.shape
    assert C == IN_FEATURES
    assert tile % 128 == 0 and HWp % tile == 0
    grid = (N, HWp // tile)
    return pl.pallas_call(
        fc_kernel,
        out_shape=jax.ShapeDtypeStruct((N, OUT_FEATURES, HWp), jnp.float32),
        grid_spec=pltpu.PrefetchScalarGridSpec(
            num_scalar_prefetch=0,
            grid=grid,
            in_specs=[
                # x tile: channels on sublanes (75 == full dim), spatial on
                # lanes (multiple of 128 -> lane-dense loads).
                pl.BlockSpec((None, C, tile), lambda n, j: (n, 0, j)),
                # weight: tiny, resident across the whole grid (constant map).
                pl.BlockSpec((1, C), lambda n, j: (0, 0)),
                # bias: a single scalar -> keep it in SMEM, off the vld path.
                pl.BlockSpec(memory_space=pltpu.MemorySpace.SMEM),
            ],
            # Lane-dense output block: (1, tile) with tile % 128 == 0
            # -> unmasked full-width stores.
            out_specs=pl.BlockSpec((None, OUT_FEATURES, tile),
                                   lambda n, j: (n, 0, j)),
        ),
        compiler_params=pltpu.CompilerParams(
            # Both grid axes are independent -> shard across v7x's 2 TCs
            # (no-op on v5e/v6e).
            dimension_semantics=("parallel", "parallel"),
        ),
    )(x3d, w, b)


def fc_forward(x_nchw, weight, bias, *, t_hw=2048):
    """Equivalent of FC.forward.

    x_nchw: (N, 75, H, W)
    weight: (1, 75)  (PyTorch nn.Linear layout: (out_features, in_features))
    bias:   (1,)
    returns (N, 1, H, W)
    """
    N, C, H, W = x_nchw.shape
    assert C == IN_FEATURES
    HW = H * W

    # Lane tile: a multiple of 128, no larger than needed for this H*W.
    # ~2K lanes * 75 ch * 4 B ~= 0.6 MB/buffer -> fits comfortably in VMEM on
    # v5e / v6e / v7x with default scoped limits (double-buffered).
    tile = min(_round_up(t_hw, 128), _round_up(HW, 128))
    HWp = _round_up(HW, tile)

    # Native layout, no permute: (N, C, H, W) -> (N, C, H*W) is a free reshape.
    x3d = x_nchw.reshape(N, C, HW).astype(jnp.float32)
    if HWp != HW:
        # Ragged spatial size: zero-pad the lane axis up to a whole tile.
        x3d = jnp.pad(x3d, ((0, 0), (0, 0), (0, HWp - HW)))

    w = weight.reshape(OUT_FEATURES, IN_FEATURES).astype(jnp.float32)  # (1, 75)
    b = bias.reshape(1, 1).astype(jnp.float32)                         # (1, 1)

    out3d = fc_pallas_3d(x3d, w, b, tile=tile)   # (N, 1, HWp)
    if HWp != HW:
        out3d = out3d[:, :, :HW]
    return out3d.reshape(N, OUT_FEATURES, H, W)


if __name__ == "__main__":
    key = jax.random.PRNGKey(0)
    k_x, k_w, k_b, k_x2 = jax.random.split(key, 4)

    # Deterministic parameter init mimicking nn.Linear default:
    # uniform(-1/sqrt(in_features), 1/sqrt(in_features)).
    bound = 1.0 / (IN_FEATURES ** 0.5)
    weight = jax.random.uniform(
        k_w, (OUT_FEATURES, IN_FEATURES), minval=-bound, maxval=bound,
        dtype=jnp.float32)
    bias = jax.random.uniform(
        k_b, (OUT_FEATURES,), minval=-bound, maxval=bound, dtype=jnp.float32)

    fwd = jax.jit(fc_forward)

    # Small shape consistent with the module (channel dim must be 75).
    N, C, H, W = 2, IN_FEATURES, 8, 8
    x = jax.random.normal(k_x, (N, C, H, W), dtype=jnp.float32)
    out = jax.block_until_ready(fwd(x, weight, bias))
    assert out.shape == (N, 1, H, W), out.shape
    ref = jnp.einsum("nchw,oc->nohw", x, weight) + bias.reshape(1, -1, 1, 1)
    assert jnp.allclose(out, ref, atol=1e-5, rtol=1e-5)

    # Ragged spatial size (H*W not a multiple of 128) to exercise padding path.
    N2, H2, W2 = 2, 13, 21
    x2 = jax.random.normal(k_x2, (N2, IN_FEATURES, H2, W2), dtype=jnp.float32)
    out2 = jax.block_until_ready(fwd(x2, weight, bias))
    assert out2.shape == (N2, 1, H2, W2), out2.shape
    ref2 = jnp.einsum("nchw,oc->nohw", x2, weight) + bias.reshape(1, -1, 1, 1)
    assert jnp.allclose(out2, ref2, atol=1e-5, rtol=1e-5)

    print("KERNEL_OK")
</pallas_src>

<mosaic_0001>
module attributes {stable_mosaic.version = 11 : i64} {
  func.func @fc_kernel(%arg0: i32, %arg1: i32, %arg2: memref<1x75x128xf32, #tpu.memory_space<vmem>>, %arg3: memref<1x75xf32, #tpu.memory_space<vmem>>, %arg4: memref<1x1xf32, #tpu.memory_space<smem>>, %arg5: memref<1x1x128xf32, #tpu.memory_space<vmem>>) attributes {dimension_semantics = [#tpu.dimension_semantics<parallel>, #tpu.dimension_semantics<parallel>], iteration_bounds = array<i64: 2, 1>, scalar_prefetch = 0 : i64, scratch_operands = 0 : i64, tpu.core_type = #tpu.core_type<tc>, window_params = [{transform_indices = @transform_0, window_bounds = array<i64: 1, 75, 128>}, {pipeline_mode = #tpu.pipeline_mode<synchronous>, transform_indices = @transform_1, window_bounds = array<i64: 1, 75>}, {transform_indices = @transform_2, window_bounds = array<i64: 1, 1>}, {transform_indices = @transform_3, window_bounds = array<i64: 1, 1, 128>}]} {
    %c0 = arith.constant 0 : index
    %c0_0 = arith.constant 0 : index
    %0 = vector.load %arg3[%c0, %c0_0] : memref<1x75xf32, #tpu.memory_space<vmem>>, vector<1x75xf32>
    %c0_1 = arith.constant 0 : index
    %c0_2 = arith.constant 0 : index
    %c0_3 = arith.constant 0 : index
    %1 = vector.load %arg2[%c0_1, %c0_2, %c0_3] : memref<1x75x128xf32, #tpu.memory_space<vmem>>, vector<1x75x128xf32>
    %2 = vector.shape_cast %1 : vector<1x75x128xf32> to vector<75x128xf32>
    %cst = arith.constant dense<0.000000e+00> : vector<1x128xf32>
    %3 = tpu.matmul %0, %2, %cst {dimension_numbers = #tpu.dot_dimension_numbers<[1], [0], [0], [1], [0, 0, 1, 1], [], []>} : vector<1x75xf32>, vector<75x128xf32>, vector<1x128xf32> -> vector<1x128xf32>
    %c0_4 = arith.constant 0 : index
    %c0_5 = arith.constant 0 : index
    %4 = memref.load %arg4[%c0_4, %c0_5] : memref<1x1xf32, #tpu.memory_space<smem>>
    %5 = vector.broadcast %4 : f32 to vector<1x128xf32>
    %6 = arith.addf %3, %5 : vector<1x128xf32>
    %c0_6 = arith.constant 0 : index
    %c0_7 = arith.constant 0 : index
    %c0_8 = arith.constant 0 : index
    %7 = vector.load %arg5[%c0_6, %c0_7, %c0_8] : memref<1x1x128xf32, #tpu.memory_space<vmem>>, vector<1x1x128xf32>
    %8 = vector.shape_cast %7 : vector<1x1x128xf32> to vector<1x128xf32>
    %9 = vector.shape_cast %6 : vector<1x128xf32> to vector<1x1x128xf32>
    tpu.vector_store %arg5[%c0_6, %c0_7, %c0_8], %9 {strides = array<i32>} : memref<1x1x128xf32, #tpu.memory_space<vmem>>, vector<1x1x128xf32>,
    return
  }
  func.func @transform_0(%arg0: i32, %arg1: i32) -> (i32, i32, i32) {
    %c0_i32 = arith.constant 0 : i32
    %c0_i32_0 = arith.constant 0 : i32
    return %arg0, %c0_i32, %arg1 : i32, i32, i32
  }
  func.func @transform_1(%arg0: i32, %arg1: i32) -> (i32, i32) {
    %c0_i32 = arith.constant 0 : i32
    %c0_i32_0 = arith.constant 0 : i32
    %c0_i32_1 = arith.constant 0 : i32
    return %c0_i32, %c0_i32_0 : i32, i32
  }
  func.func @transform_2(%arg0: i32, %arg1: i32) -> (i32, i32) {
    %c0_i32 = arith.constant 0 : i32
    %c0_i32_0 = arith.constant 0 : i32
    %c0_i32_1 = arith.constant 0 : i32
    return %c0_i32, %c0_i32_0 : i32, i32
  }
  func.func @transform_3(%arg0: i32, %arg1: i32) -> (i32, i32, i32) {
    %c0_i32 = arith.constant 0 : i32
    %c0_i32_0 = arith.constant 0 : i32
    return %arg0, %c0_i32, %arg1 : i32, i32, i32
  }
}

</mosaic_0001>

<bundles_post_ra>
// kernel: fc_forward.1
= control target key start
LH: loop header
LB: loop body
LE: loop exit
PB: predicated region body
PF: predicated region fallthrough
CT: control target
= control target key end

     0   :  { %s394_s14 = smov 0   ;;  %s396_s15 = smov 0   ;;  %s434_s0 = inlined_call_operand.vmem [shape: f32[2,75,128], index: 0, kind: input, shape index: {}]   ;;  %s435_s1 = inlined_call_operand.vmem [shape: f32[1,75], index: 1, kind: input, shape index: {}]   ;;  %s436_s2 = inlined_call_operand.<no memory space> [shape: f32[1,1], index: 2, kind: input, shape index: {}]   ;;  %s437_s3 = inlined_call_operand.vmem [shape: f32[2,1,128], index: 3, kind: output, shape index: {}]  }
   0x1   :  { %8 = sst [smem:[#allocation2]] %s436_s2  ;;  %s398_s16 = smov 0  }
   0x2 LB: > { %s26_s2 = sadd.s32 1, %s365_s15  ;;  %p316_p0 = scmp.ge.s32.totalorder %s369_s16, 1  ;;  %s369_s16 = sphi %s398_s16, %s14_s16   ;;  %s365_s15 = sphi %s396_s15, %s439_s15   ;;  %s361_s14 = sphi %s394_s14, %s438_s14  }
   0x3   : > { %p28_p1 = scmp.ge.s32.totalorder %s26_s2, 2  ;;  %p157_p2 = scmp.lt.s32.totalorder %s369_s16, 3 }
   0x5   : > { %s441_s2 = smov (%p28_p1, %s26_s2), 0  ;;  %p158_p3 = pnand %p316_p0, %p157_p2 }
   0x6   : > { %p185_p4 = scmp.lt.s32.totalorder (!%p158_p3), %s361_s14, 1  ;;  %s210_s23 = sld [smem:[#allocation2]] (!%p158_p3) }
   0x7   : > { %161 = sbr.rel (%p158_p3) target bundleno = 165 (0xa5), region = 32 }
   0xc   : > { %s443_s14 = smov (!%p185_p4, %s361_s14), 1  ;;  %vm216_vm0 = vcmask 1042432   ;;  %v199_v10 = vld [vmem:[%s435_s1] sm:$0x1]  ;;  %vm212_vm1 = vcmask 613376   ;;  %v211_v11 = vstv %s210_s23 }
   0xd   : > { %s322_s17 = smul.u32 80, %s443_s14  ;;  %s198_s26 = scalar_lea.vmem %s437_s3, %s443_s14 }
   0xf   : > { %s192_s20 = scalar_lea.vmem %s434_s0, %s322_s17 }
  0x10   : > { %v209_v0 = vld [vmem:[%s192_s20 + $0x48] sm:$0x7]  ;;  %v208_v1 = vld [vmem:[%s192_s20 + $0x40] sm:$0xff]  ;;  %v207_v2 = vld [vmem:[%s192_s20 + $0x38] sm:$0xff] }
  0x11   : > { %318 = vmatpush.msk.msra.mxu0 %vm216_vm0, %v209_v0  ;;  %v206_v3 = vld [vmem:[%s192_s20 + $0x30] sm:$0xff]  ;;  %v205_v4 = vld [vmem:[%s192_s20 + $0x28] sm:$0xff]  ;;  %v204_v5 = vld [vmem:[%s192_s20 + $0x20] sm:$0xff] }
  0x12   : > { %v203_v6 = vld [vmem:[%s192_s20 + $0x18] sm:$0xff]  ;;  %v202_v7 = vld [vmem:[%s192_s20 + $0x10] sm:$0xff]  ;;  %v201_v8 = vld [vmem:[%s192_s20 + $0x8] sm:$0xff] }
  0x13   : > { %227 = vmatpush.msra.mxu0 %v208_v1  ;;  %v200_v9 = vld [vmem:[%s192_s20] sm:$0xff] }
  0x15   : > { %228 = vmatpush.msra.mxu0 %v207_v2 }
  0x17   : > { %229 = vmatpush.msra.mxu0 %v206_v3 }
  0x19   : > { %230 = vmatpush.msra.mxu0 %v205_v4 }
  0x1b   : > { %231 = vmatpush.msra.mxu0 %v204_v5 }
  0x1d   : > { %232 = vmatpush.msra.mxu0 %v203_v6 }
  0x1f   : > { %233 = vmatpush.msra.mxu0 %v202_v7 }
  0x21   : > { %234 = vmatpush.msra.mxu0 %v201_v8 }
  0x23   : > { %235 = vmatpush.msra.mxu0 %v200_v9 }
  0x24   : > { %319 = vmatmul.msk.f32.vlgmr.msra.gmra.mxu0 %vm212_vm1, %v199_v10 }
  0xa1   : > { %v237_v12 = vpop.f32.mrf.mxu0 }
  0xa2   : > { %v238_v13 = vadd.f32 %v237_v12, %v211_v11 }
  0xa4   : > { %240 = vst [vmem:[%s198_s26] sm:$0x1] %v238_v13 }
  0xa5 PF: > { %s14_s16 = sadd.s32 1, %s369_s16   ;;  %s438_s14 = smov %s365_s15 }
  0xa6   : > { %p11_p5 = scmp.ge.s32.totalorder %s14_s16, 4   ;;  %s439_s15 = smov %s441_s2 }
  0xa8   :  { %13 = sbr.rel (!%p11_p5) target bundleno = 2 (0x2), region = 62 }

</bundles_post_ra>
